<compile_context>
chip_gen: v7x
topology: tpu7x:2x2x1
jax: 0.10.0
libtpu: 0.0.40
codegen_flags: <defaults>
</compile_context>

<pallas_src>
import math

import jax
import jax.numpy as jnp
from jax import lax
from jax.experimental import pallas as pl
from jax.experimental.pallas import tpu as pltpu


# ----------------------- fused multi-head cross attention --------------------

def _make_fused_mha_kernel(num_heads, batch_tile, use_bf16):
    cdtype = jnp.bfloat16 if use_bf16 else jnp.float32
    # contract last dim of lhs with last dim of rhs  ==  lhs @ rhs.T (no .T!)
    cd_last = (((1,), (1,)), ((), ()))
    Bt = batch_tile

    def kernel(valid_ref, q_ref, k_ref, v_ref,
               wq_ref, wk_ref, wv_ref, wo_ref,
               out_ref, attn_ref):
        _, Lqt, Dq = q_ref.shape
        _, Lk, Dk = k_ref.shape
        Dv = v_ref.shape[-1]
        dh = wq_ref.shape[1]
        H = wo_ref.shape[1]
        b0 = pl.program_id(0) * Bt

        scale = jnp.float32(1.0 / math.sqrt(dh))
        neg = jnp.float32(-1000000.0)

        # Collapse batch rows for the projections (fills MXU rows; one matmul
        # per head instead of per (head, batch element)).
        q2d = q_ref[...].reshape(Bt * Lqt, Dq).astype(cdtype)
        k2d = k_ref[...].reshape(Bt * Lk, Dk).astype(cdtype)
        v2d = v_ref[...].reshape(Bt * Lk, Dv).astype(cdtype)

        # Hoisted mask (one iota + compare per step, reused by every head).
        col = lax.broadcasted_iota(jnp.int32, (Lqt, Lk), 1)
        mask = jnp.stack(
            [col < valid_ref[b0 + i] for i in range(Bt)], axis=0)  # (Bt,Lqt,Lk)

        out_acc = jnp.zeros((Bt * Lqt, H), jnp.float32)
        attn_parts = []
        for h in range(num_heads):                      # static unroll, nh small
            # Head-major projections: x @ W_h.T — no dh-wide lane slices.
            qh = lax.dot_general(q2d, wq_ref[h], cd_last,
                                 preferred_element_type=jnp.float32)
            kh = lax.dot_general(k2d, wk_ref[h], cd_last,
                                 preferred_element_type=jnp.float32)
            vh = lax.dot_general(v2d, wv_ref[h], cd_last,
                                 preferred_element_type=jnp.float32)
            qh = qh.reshape(Bt, Lqt, dh).astype(cdtype)
            kh = kh.reshape(Bt, Lk, dh).astype(cdtype)
            vh = vh.reshape(Bt, Lk, dh).astype(cdtype)

            # scores = q_h @ k_h.T / sqrt(dh)  (batched over Bt, f32 accumulate)
            scores = lax.dot_general(qh, kh, (((2,), (2,)), ((0,), (0,))),
                                     preferred_element_type=jnp.float32) * scale
            # masked softmax (f32), matching d2l set-to(-1e6) semantics
            scores = jnp.where(mask, scores, neg)
            m = jnp.max(scores, axis=-1, keepdims=True)
            p = jnp.exp(scores - m)
            denom = jnp.sum(p, axis=-1, keepdims=True)
            attn = p * pl.reciprocal(denom, approx=True)   # EUP, off the VALU
            attn_parts.append(attn)

            # dropout(attn) in eval mode == identity
            ctx = lax.dot_general(attn.astype(cdtype), vh,
                                  (((2,), (1,)), ((0,), (0,))),
                                  preferred_element_type=jnp.float32)
            # Accumulate the output projection per head (replaces concat):
            # out += ctx_h @ W_o[:, h*dh:(h+1)*dh].T
            out_acc = out_acc + lax.dot_general(
                ctx.reshape(Bt * Lqt, dh).astype(cdtype), wo_ref[h], cd_last,
                preferred_element_type=jnp.float32)

        # Single batched store of all attention weights (one slab per step).
        attn_ref[...] = jnp.stack(attn_parts, axis=1).astype(attn_ref.dtype)
        out_ref[...] = out_acc.reshape(Bt, Lqt, H).astype(out_ref.dtype)

    return kernel


def _pick_batch_tile(B):
    """Largest Bt dividing B that still leaves >= 2 grid steps (v7x: 2 TCs)."""
    if B <= 1:
        return 1
    for bt in (8, 4, 2, 1):
        if B % bt == 0 and B // bt >= 2:
            return bt
    return 1


def _pick_q_tile(Lq):
    """Tile Lq only when it is large (keeps attn writeback blocks bounded)."""
    if Lq <= 1024:
        return Lq
    for t in (1024, 512, 256, 128):
        if Lq % t == 0:
            return t
    return Lq


def cross_mha_forward(q, k, v, valid_lens, W_q, W_k, W_v, W_o, num_heads,
                      *, use_bf16=False, batch_tile=None, q_tile=None):
    B, Lq, Dq = q.shape
    _, Lk, Dk = k.shape
    Dv = v.shape[2]
    H = W_q.shape[0]
    assert H % num_heads == 0
    dh = H // num_heads

    Bt = batch_tile if batch_tile is not None else _pick_batch_tile(B)
    assert B % Bt == 0
    Lqt = q_tile if q_tile is not None else _pick_q_tile(Lq)
    assert Lq % Lqt == 0
    n_q = Lq // Lqt

    if valid_lens is None:
        vl = jnp.full((B,), Lk, dtype=jnp.int32)
    else:
        # TODO(synk): 2-D (per-query) valid_lens is not supported by this kernel.
        vl = valid_lens.astype(jnp.int32)

    cdtype = jnp.bfloat16 if use_bf16 else jnp.float32
    # Head-major weights: (nh, dh, D) → per-head projections without lane slices.
    wq = W_q.reshape(num_heads, dh, Dq).astype(cdtype)
    wk = W_k.reshape(num_heads, dh, Dk).astype(cdtype)
    wv = W_v.reshape(num_heads, dh, Dv).astype(cdtype)
    # W_o split per head: wo[h] = W_o[:, h*dh:(h+1)*dh]  (shape (nh, H, dh)).
    wo = jnp.transpose(W_o.reshape(H, num_heads, dh), (1, 0, 2)).astype(cdtype)

    grid = (B // Bt, n_q)

    in_specs = [
        pl.BlockSpec((Bt, Lqt, Dq), lambda b, qi, vl_ref: (b, qi, 0)),
        pl.BlockSpec((Bt, Lk, Dk), lambda b, qi, vl_ref: (b, 0, 0)),
        pl.BlockSpec((Bt, Lk, Dv), lambda b, qi, vl_ref: (b, 0, 0)),
        # Weights: constant block index → fetched once, stays resident in VMEM.
        pl.BlockSpec((num_heads, dh, Dq), lambda b, qi, vl_ref: (0, 0, 0)),
        pl.BlockSpec((num_heads, dh, Dk), lambda b, qi, vl_ref: (0, 0, 0)),
        pl.BlockSpec((num_heads, dh, Dv), lambda b, qi, vl_ref: (0, 0, 0)),
        pl.BlockSpec((num_heads, H, dh), lambda b, qi, vl_ref: (0, 0, 0)),
    ]
    out_specs = [
        pl.BlockSpec((Bt, Lqt, H), lambda b, qi, vl_ref: (b, qi, 0)),
        pl.BlockSpec((Bt, num_heads, Lqt, Lk), lambda b, qi, vl_ref: (b, 0, qi, 0)),
    ]

    # Explicit VMEM budget (v5e default scoped limit is only 16 MiB).
    itemsize = 2 if use_bf16 else 4
    block_bytes = 4 * (Bt * Lqt * (Dq + H) + Bt * Lk * (Dk + Dv)
                       + Bt * num_heads * Lqt * Lk) \
        + itemsize * (wq.size + wk.size + wv.size + wo.size)
    vmem_limit = int(min(max(2 * block_bytes + (8 << 20), 32 << 20), 128 << 20))

    flops = 2 * B * (Lq * Dq * H + n_q * Lk * (Dk + Dv) * H
                     + 2 * num_heads * Lq * Lk * dh + Lq * H * H)
    transcendentals = B * num_heads * Lq * Lk
    bytes_accessed = (q.size + n_q * (k.size + v.size)) * q.dtype.itemsize \
        + itemsize * (wq.size + wk.size + wv.size + wo.size) \
        + 4 * (B * Lq * H + B * num_heads * Lq * Lk)

    out, attn = pl.pallas_call(
        _make_fused_mha_kernel(num_heads, Bt, use_bf16),
        grid_spec=pltpu.PrefetchScalarGridSpec(
            num_scalar_prefetch=1,
            grid=grid,
            in_specs=in_specs,
            out_specs=out_specs),
        out_shape=(
            jax.ShapeDtypeStruct((B, Lq, H), q.dtype),
            jax.ShapeDtypeStruct((B, num_heads, Lq, Lk), jnp.float32),
        ),
        compiler_params=pltpu.CompilerParams(
            dimension_semantics=("parallel", "parallel"),
            vmem_limit_bytes=vmem_limit),
        cost_estimate=pl.CostEstimate(
            flops=flops,
            transcendentals=transcendentals,
            bytes_accessed=bytes_accessed),
    )(vl, q, k, v, wq, wk, wv, wo)

    # (B, nh, Lq, Lk) -> (B*nh, Lq, Lk): pure reshape, matches PyTorch ordering.
    return out, attn.reshape(B * num_heads, Lq, Lk)


# ----------------------------- module wrapper ---------------------------------

class CrossMultiHeadAttentionG:
    """Pallas-backed equivalent of cross_MultiHeadAttention_G (bias=False)."""

    def __init__(self, query_size, key_size, value_size, num_hiddens,
                 num_heads, dropout=0.0, bias=False, *, key):
        assert not bias, "bias=True is not implemented (module default is False)"
        del dropout  # eval mode: dropout == identity
        self.num_heads = num_heads
        k1, k2, k3, k4 = jax.random.split(key, 4)

        def init_w(kk, out_f, in_f):
            bound = 1.0 / math.sqrt(in_f)
            return jax.random.uniform(kk, (out_f, in_f), jnp.float32,
                                      -bound, bound)

        self.W_q = init_w(k1, num_hiddens, query_size)
        self.W_k = init_w(k2, num_hiddens, key_size)
        self.W_v = init_w(k3, num_hiddens, value_size)
        self.W_o = init_w(k4, num_hiddens, num_hiddens)

    def __call__(self, q, k, v, valid_lens, use_bf16=False):
        return cross_mha_forward(q, k, v, valid_lens,
                                 self.W_q, self.W_k, self.W_v, self.W_o,
                                 self.num_heads, use_bf16=use_bf16)


# --------------------------- pure-JAX reference --------------------------------

def _transpose_qkv_ref(X, num_heads):
    B, L, H = X.shape
    X = X.reshape(B, L, num_heads, H // num_heads)
    X = jnp.transpose(X, (0, 2, 1, 3))
    return X.reshape(B * num_heads, L, H // num_heads)


def _transpose_output_ref(X, num_heads):
    BH, L, dh = X.shape
    X = X.reshape(BH // num_heads, num_heads, L, dh)
    X = jnp.transpose(X, (0, 2, 1, 3))
    return X.reshape(X.shape[0], X.shape[1], -1)


def _reference(module, q, k, v, valid_lens):
    Lk = k.shape[1]
    Q = q @ module.W_q.T
    K = k @ module.W_k.T
    V = v @ module.W_v.T
    queries = _transpose_qkv_ref(Q, module.num_heads)
    keys = _transpose_qkv_ref(K, module.num_heads)
    values = _transpose_qkv_ref(V, module.num_heads)
    scores = jnp.einsum("bqd,bkd->bqk", queries, keys) / math.sqrt(
        queries.shape[-1])
    vl = jnp.repeat(valid_lens.astype(jnp.int32), module.num_heads, axis=0)
    mask = jnp.arange(Lk)[None, None, :] < vl[:, None, None]
    scores = jnp.where(mask, scores, -1000000.0)
    attn_w = jax.nn.softmax(scores, axis=-1)
    ctx = jnp.einsum("bqk,bkd->bqd", attn_w, values)
    out = _transpose_output_ref(ctx, module.num_heads) @ module.W_o.T
    return out, attn_w


# ----------------------------------- main ---------------------------------------

if __name__ == "__main__":
    key = jax.random.PRNGKey(0)
    kq, kk, kv, kw = jax.random.split(key, 4)

    B, Lq, Lk = 2, 8, 8
    query_size = key_size = value_size = 16
    num_hiddens, num_heads = 32, 4

    q = jax.random.normal(kq, (B, Lq, query_size), jnp.float32)
    k = jax.random.normal(kk, (B, Lk, key_size), jnp.float32)
    v = jax.random.normal(kv, (B, Lk, value_size), jnp.float32)
    valid_lens = jnp.array([5, 8], dtype=jnp.int32)

    module = CrossMultiHeadAttentionG(
        query_size, key_size, value_size, num_hiddens, num_heads,
        dropout=0.0, key=kw)

    # f32 path (exact semantics)
    attn_output, attn_w = module(q, k, v, valid_lens)
    jax.block_until_ready((attn_output, attn_w))

    ref_out, ref_w = _reference(module, q, k, v, valid_lens)
    assert attn_output.shape == (B, Lq, num_hiddens)
    assert attn_w.shape == (B * num_heads, Lq, Lk)
    assert jnp.allclose(attn_output, ref_out, atol=2e-3, rtol=2e-3)
    assert jnp.allclose(attn_w, ref_w, atol=2e-3, rtol=2e-3)

    # bf16 MXU-operand path (v6e/v7x throughput mode; softmax stays f32)
    out_bf, attn_bf = module(q, k, v, valid_lens, use_bf16=True)
    jax.block_until_ready((out_bf, attn_bf))
    assert out_bf.shape == (B, Lq, num_hiddens)
    assert attn_bf.shape == (B * num_heads, Lq, Lk)
    assert jnp.allclose(out_bf, ref_out, atol=8e-2, rtol=8e-2)
    assert jnp.allclose(attn_bf, ref_w, atol=3e-2, rtol=3e-2)

    print("KERNEL_OK")
</pallas_src>

<mosaic_0001>
module attributes {stable_mosaic.version = 11 : i64} {
  func.func @kernel(%arg0: i32, %arg1: i32, %arg2: memref<2xi32, #tpu.memory_space<smem>>, %arg3: memref<1x8x16xf32, #tpu.memory_space<vmem>>, %arg4: memref<1x8x16xf32, #tpu.memory_space<vmem>>, %arg5: memref<1x8x16xf32, #tpu.memory_space<vmem>>, %arg6: memref<4x8x16xf32, #tpu.memory_space<vmem>>, %arg7: memref<4x8x16xf32, #tpu.memory_space<vmem>>, %arg8: memref<4x8x16xf32, #tpu.memory_space<vmem>>, %arg9: memref<4x32x8xf32, #tpu.memory_space<vmem>>, %arg10: memref<1x8x32xf32, #tpu.memory_space<vmem>>, %arg11: memref<1x4x8x8xf32, #tpu.memory_space<vmem>>) attributes {dimension_semantics = [#tpu.dimension_semantics<parallel>, #tpu.dimension_semantics<parallel>], iteration_bounds = array<i64: 2, 1>, scalar_prefetch = 1 : i64, scratch_operands = 0 : i64, tpu.core_type = #tpu.core_type<tc>, window_params = [{transform_indices = @transform_0, window_bounds = array<i64: 1, 8, 16>}, {transform_indices = @transform_1, window_bounds = array<i64: 1, 8, 16>}, {transform_indices = @transform_2, window_bounds = array<i64: 1, 8, 16>}, {pipeline_mode = #tpu.pipeline_mode<synchronous>, transform_indices = @transform_3, window_bounds = array<i64: 4, 8, 16>}, {pipeline_mode = #tpu.pipeline_mode<synchronous>, transform_indices = @transform_4, window_bounds = array<i64: 4, 8, 16>}, {pipeline_mode = #tpu.pipeline_mode<synchronous>, transform_indices = @transform_5, window_bounds = array<i64: 4, 8, 16>}, {pipeline_mode = #tpu.pipeline_mode<synchronous>, transform_indices = @transform_6, window_bounds = array<i64: 4, 32, 8>}, {transform_indices = @transform_7, window_bounds = array<i64: 1, 8, 32>}, {transform_indices = @transform_8, window_bounds = array<i64: 1, 4, 8, 8>}]} {
    %c1_i32 = arith.constant 1 : i32
    %0 = arith.muli %arg0, %c1_i32 : i32
    %c0 = arith.constant 0 : index
    %c0_0 = arith.constant 0 : index
    %c0_1 = arith.constant 0 : index
    %1 = vector.load %arg3[%c0, %c0_0, %c0_1] : memref<1x8x16xf32, #tpu.memory_space<vmem>>, vector<1x8x16xf32>
    %2 = vector.shape_cast %1 : vector<1x8x16xf32> to vector<8x16xf32>
    %c0_2 = arith.constant 0 : index
    %c0_3 = arith.constant 0 : index
    %c0_4 = arith.constant 0 : index
    %3 = vector.load %arg4[%c0_2, %c0_3, %c0_4] : memref<1x8x16xf32, #tpu.memory_space<vmem>>, vector<1x8x16xf32>
    %4 = vector.shape_cast %3 : vector<1x8x16xf32> to vector<8x16xf32>
    %c0_5 = arith.constant 0 : index
    %c0_6 = arith.constant 0 : index
    %c0_7 = arith.constant 0 : index
    %5 = vector.load %arg5[%c0_5, %c0_6, %c0_7] : memref<1x8x16xf32, #tpu.memory_space<vmem>>, vector<1x8x16xf32>
    %6 = vector.shape_cast %5 : vector<1x8x16xf32> to vector<8x16xf32>
    %7 = tpu.iota {dimensions = array<i32: 1>} : vector<8x8xi32>
    %c0_i32 = arith.constant 0 : i32
    %8 = arith.addi %0, %c0_i32 : i32
    %9 = arith.index_cast %8 : i32 to index
    %10 = memref.load %arg2[%9] : memref<2xi32, #tpu.memory_space<smem>>
    %11 = vector.broadcast %10 : i32 to vector<8x8xi32>
    %12 = arith.cmpi slt, %7, %11 : vector<8x8xi32>
    %13 = vector.shape_cast %12 : vector<8x8xi1> to vector<1x8x8xi1>
    %cst = arith.constant 0.000000e+00 : f32
    %14 = vector.broadcast %cst : f32 to vector<8x32xf32>
    %c0_8 = arith.constant 0 : index
    %c0_9 = arith.constant 0 : index
    %c0_10 = arith.constant 0 : index
    %15 = vector.load %arg6[%c0_8, %c0_9, %c0_10] : memref<4x8x16xf32, #tpu.memory_space<vmem>>, vector<1x8x16xf32>
    %16 = vector.shape_cast %15 : vector<1x8x16xf32> to vector<8x16xf32>
    %cst_11 = arith.constant dense<0.000000e+00> : vector<8x8xf32>
    %17 = tpu.matmul %2, %16, %cst_11 {dimension_numbers = #tpu.dot_dimension_numbers<[1], [1], [0], [0], [0, 0, 1, 0], [], []>} : vector<8x16xf32>, vector<8x16xf32>, vector<8x8xf32> -> vector<8x8xf32>
    %c0_12 = arith.constant 0 : index
    %c0_13 = arith.constant 0 : index
    %c0_14 = arith.constant 0 : index
    %18 = vector.load %arg7[%c0_12, %c0_13, %c0_14] : memref<4x8x16xf32, #tpu.memory_space<vmem>>, vector<1x8x16xf32>
    %19 = vector.shape_cast %18 : vector<1x8x16xf32> to vector<8x16xf32>
    %cst_15 = arith.constant dense<0.000000e+00> : vector<8x8xf32>
    %20 = tpu.matmul %4, %19, %cst_15 {dimension_numbers = #tpu.dot_dimension_numbers<[1], [1], [0], [0], [0, 0, 1, 0], [], []>} : vector<8x16xf32>, vector<8x16xf32>, vector<8x8xf32> -> vector<8x8xf32>
    %c0_16 = arith.constant 0 : index
    %c0_17 = arith.constant 0 : index
    %c0_18 = arith.constant 0 : index
    %21 = vector.load %arg8[%c0_16, %c0_17, %c0_18] : memref<4x8x16xf32, #tpu.memory_space<vmem>>, vector<1x8x16xf32>
    %22 = vector.shape_cast %21 : vector<1x8x16xf32> to vector<8x16xf32>
    %cst_19 = arith.constant dense<0.000000e+00> : vector<8x8xf32>
    %23 = tpu.matmul %6, %22, %cst_19 {dimension_numbers = #tpu.dot_dimension_numbers<[1], [1], [0], [0], [0, 0, 1, 0], [], []>} : vector<8x16xf32>, vector<8x16xf32>, vector<8x8xf32> -> vector<8x8xf32>
    %24 = vector.shape_cast %17 : vector<8x8xf32> to vector<1x8x8xf32>
    %25 = vector.shape_cast %20 : vector<8x8xf32> to vector<1x8x8xf32>
    %26 = vector.shape_cast %23 : vector<8x8xf32> to vector<1x8x8xf32>
    %cst_20 = arith.constant dense<0.000000e+00> : vector<1x8x8xf32>
    %27 = tpu.matmul %24, %25, %cst_20 {dimension_numbers = #tpu.dot_dimension_numbers<[2], [2], [1], [1], [0, 0, 0, 1, 1, 1], [0], [0]>} : vector<1x8x8xf32>, vector<1x8x8xf32>, vector<1x8x8xf32> -> vector<1x8x8xf32>
    %cst_21 = arith.constant 0.353553385 : f32
    %28 = vector.broadcast %cst_21 : f32 to vector<1x8x8xf32>
    %29 = arith.mulf %27, %28 : vector<1x8x8xf32>
    %cst_22 = arith.constant -1.000000e+06 : f32
    %30 = vector.broadcast %cst_22 : f32 to vector<1x8x8xf32>
    %31 = arith.select %13, %29, %30 : vector<1x8x8xi1>, vector<1x8x8xf32>
    %cst_23 = arith.constant dense<0xFF800000> : vector<1x8xf32>
    %32 = vector.multi_reduction <maximumf>, %31, %cst_23 [2] : vector<1x8x8xf32> to vector<1x8xf32>
    %33 = vector.shape_cast %32 : vector<1x8xf32> to vector<1x8x1xf32>
    %34 = vector.broadcast %33 : vector<1x8x1xf32> to vector<1x8x8xf32>
    %35 = arith.subf %31, %34 : vector<1x8x8xf32>
    %36 = math.exp %35 : vector<1x8x8xf32>
    %cst_24 = arith.constant dense<0.000000e+00> : vector<1x8xf32>
    %37 = vector.multi_reduction <add>, %36, %cst_24 [2] : vector<1x8x8xf32> to vector<1x8xf32>
    %38 = vector.shape_cast %37 : vector<1x8xf32> to vector<1x8x1xf32>
    %39 = tpu.reciprocal %38 {approx = true} : vector<1x8x1xf32> -> vector<1x8x1xf32>
    %40 = vector.broadcast %39 : vector<1x8x1xf32> to vector<1x8x8xf32>
    %41 = arith.mulf %36, %40 : vector<1x8x8xf32>
    %cst_25 = arith.constant dense<0.000000e+00> : vector<1x8x8xf32>
    %42 = tpu.matmul %41, %26, %cst_25 {dimension_numbers = #tpu.dot_dimension_numbers<[2], [1], [1], [2], [0, 0, 0, 1, 1, 2], [0], [0]>} : vector<1x8x8xf32>, vector<1x8x8xf32>, vector<1x8x8xf32> -> vector<1x8x8xf32>
    %43 = vector.shape_cast %42 : vector<1x8x8xf32> to vector<8x8xf32>
    %c0_26 = arith.constant 0 : index
    %c0_27 = arith.constant 0 : index
    %c0_28 = arith.constant 0 : index
    %44 = vector.load %arg9[%c0_26, %c0_27, %c0_28] : memref<4x32x8xf32, #tpu.memory_space<vmem>>, vector<1x32x8xf32>
    %45 = vector.shape_cast %44 : vector<1x32x8xf32> to vector<32x8xf32>
    %cst_29 = arith.constant dense<0.000000e+00> : vector<8x32xf32>
    %46 = tpu.matmul %43, %45, %cst_29 {dimension_numbers = #tpu.dot_dimension_numbers<[1], [1], [0], [0], [0, 0, 1, 0], [], []>} : vector<8x8xf32>, vector<32x8xf32>, vector<8x32xf32> -> vector<8x32xf32>
    %47 = arith.addf %14, %46 : vector<8x32xf32>
    %c1 = arith.constant 1 : index
    %c0_30 = arith.constant 0 : index
    %c0_31 = arith.constant 0 : index
    %48 = vector.load %arg6[%c1, %c0_30, %c0_31] : memref<4x8x16xf32, #tpu.memory_space<vmem>>, vector<1x8x16xf32>
    %49 = vector.shape_cast %48 : vector<1x8x16xf32> to vector<8x16xf32>
    %cst_32 = arith.constant dense<0.000000e+00> : vector<8x8xf32>
    %50 = tpu.matmul %2, %49, %cst_32 {dimension_numbers = #tpu.dot_dimension_numbers<[1], [1], [0], [0], [0, 0, 1, 0], [], []>} : vector<8x16xf32>, vector<8x16xf32>, vector<8x8xf32> -> vector<8x8xf32>
    %c1_33 = arith.constant 1 : index
    %c0_34 = arith.constant 0 : index
    %c0_35 = arith.constant 0 : index
    %51 = vector.load %arg7[%c1_33, %c0_34, %c0_35] : memref<4x8x16xf32, #tpu.memory_space<vmem>>, vector<1x8x16xf32>
    %52 = vector.shape_cast %51 : vector<1x8x16xf32> to vector<8x16xf32>
    %cst_36 = arith.constant dense<0.000000e+00> : vector<8x8xf32>
    %53 = tpu.matmul %4, %52, %cst_36 {dimension_numbers = #tpu.dot_dimension_numbers<[1], [1], [0], [0], [0, 0, 1, 0], [], []>} : vector<8x16xf32>, vector<8x16xf32>, vector<8x8xf32> -> vector<8x8xf32>
    %c1_37 = arith.constant 1 : index
    %c0_38 = arith.constant 0 : index
    %c0_39 = arith.constant 0 : index
    %54 = vector.load %arg8[%c1_37, %c0_38, %c0_39] : memref<4x8x16xf32, #tpu.memory_space<vmem>>, vector<1x8x16xf32>
    %55 = vector.shape_cast %54 : vector<1x8x16xf32> to vector<8x16xf32>
    %cst_40 = arith.constant dense<0.000000e+00> : vector<8x8xf32>
    %56 = tpu.matmul %6, %55, %cst_40 {dimension_numbers = #tpu.dot_dimension_numbers<[1], [1], [0], [0], [0, 0, 1, 0], [], []>} : vector<8x16xf32>, vector<8x16xf32>, vector<8x8xf32> -> vector<8x8xf32>
    %57 = vector.shape_cast %50 : vector<8x8xf32> to vector<1x8x8xf32>
    %58 = vector.shape_cast %53 : vector<8x8xf32> to vector<1x8x8xf32>
    %59 = vector.shape_cast %56 : vector<8x8xf32> to vector<1x8x8xf32>
    %cst_41 = arith.constant dense<0.000000e+00> : vector<1x8x8xf32>
    %60 = tpu.matmul %57, %58, %cst_41 {dimension_numbers = #tpu.dot_dimension_numbers<[2], [2], [1], [1], [0, 0, 0, 1, 1, 1], [0], [0]>} : vector<1x8x8xf32>, vector<1x8x8xf32>, vector<1x8x8xf32> -> vector<1x8x8xf32>
    %cst_42 = arith.constant 0.353553385 : f32
    %61 = vector.broadcast %cst_42 : f32 to vector<1x8x8xf32>
    %62 = arith.mulf %60, %61 : vector<1x8x8xf32>
    %cst_43 = arith.constant -1.000000e+06 : f32
    %63 = vector.broadcast %cst_43 : f32 to vector<1x8x8xf32>
    %64 = arith.select %13, %62, %63 : vector<1x8x8xi1>, vector<1x8x8xf32>
    %cst_44 = arith.constant dense<0xFF800000> : vector<1x8xf32>
    %65 = vector.multi_reduction <maximumf>, %64, %cst_44 [2] : vector<1x8x8xf32> to vector<1x8xf32>
    %66 = vector.shape_cast %65 : vector<1x8xf32> to vector<1x8x1xf32>
    %67 = vector.broadcast %66 : vector<1x8x1xf32> to vector<1x8x8xf32>
    %68 = arith.subf %64, %67 : vector<1x8x8xf32>
    %69 = math.exp %68 : vector<1x8x8xf32>
    %cst_45 = arith.constant dense<0.000000e+00> : vector<1x8xf32>
    %70 = vector.multi_reduction <add>, %69, %cst_45 [2] : vector<1x8x8xf32> to vector<1x8xf32>
    %71 = vector.shape_cast %70 : vector<1x8xf32> to vector<1x8x1xf32>
    %72 = tpu.reciprocal %71 {approx = true} : vector<1x8x1xf32> -> vector<1x8x1xf32>
    %73 = vector.broadcast %72 : vector<1x8x1xf32> to vector<1x8x8xf32>
    %74 = arith.mulf %69, %73 : vector<1x8x8xf32>
    %cst_46 = arith.constant dense<0.000000e+00> : vector<1x8x8xf32>
    %75 = tpu.matmul %74, %59, %cst_46 {dimension_numbers = #tpu.dot_dimension_numbers<[2], [1], [1], [2], [0, 0, 0, 1, 1, 2], [0], [0]>} : vector<1x8x8xf32>, vector<1x8x8xf32>, vector<1x8x8xf32> -> vector<1x8x8xf32>
    %76 = vector.shape_cast %75 : vector<1x8x8xf32> to vector<8x8xf32>
    %c1_47 = arith.constant 1 : index
    %c0_48 = arith.constant 0 : index
    %c0_49 = arith.constant 0 : index
    %77 = vector.load %arg9[%c1_47, %c0_48, %c0_49] : memref<4x32x8xf32, #tpu.memory_space<vmem>>, vector<1x32x8xf32>
    %78 = vector.shape_cast %77 : vector<1x32x8xf32> to vector<32x8xf32>
    %cst_50 = arith.constant dense<0.000000e+00> : vector<8x32xf32>
    %79 = tpu.matmul %76, %78, %cst_50 {dimension_numbers = #tpu.dot_dimension_numbers<[1], [1], [0], [0], [0, 0, 1, 0], [], []>} : vector<8x8xf32>, vector<32x8xf32>, vector<8x32xf32> -> vector<8x32xf32>
    %80 = arith.addf %47, %79 : vector<8x32xf32>
    %c2 = arith.constant 2 : index
    %c0_51 = arith.constant 0 : index
    %c0_52 = arith.constant 0 : index
    %81 = vector.load %arg6[%c2, %c0_51, %c0_52] : memref<4x8x16xf32, #tpu.memory_space<vmem>>, vector<1x8x16xf32>
    %82 = vector.shape_cast %81 : vector<1x8x16xf32> to vector<8x16xf32>
    %cst_53 = arith.constant dense<0.000000e+00> : vector<8x8xf32>
    %83 = tpu.matmul %2, %82, %cst_53 {dimension_numbers = #tpu.dot_dimension_numbers<[1], [1], [0], [0], [0, 0, 1, 0], [], []>} : vector<8x16xf32>, vector<8x16xf32>, vector<8x8xf32> -> vector<8x8xf32>
    %c2_54 = arith.constant 2 : index
    %c0_55 = arith.constant 0 : index
    %c0_56 = arith.constant 0 : index
    %84 = vector.load %arg7[%c2_54, %c0_55, %c0_56] : memref<4x8x16xf32, #tpu.memory_space<vmem>>, vector<1x8x16xf32>
    %85 = vector.shape_cast %84 : vector<1x8x16xf32> to vector<8x16xf32>
    %cst_57 = arith.constant dense<0.000000e+00> : vector<8x8xf32>
    %86 = tpu.matmul %4, %85, %cst_57 {dimension_numbers = #tpu.dot_dimension_numbers<[1], [1], [0], [0], [0, 0, 1, 0], [], []>} : vector<8x16xf32>, vector<8x16xf32>, vector<8x8xf32> -> vector<8x8xf32>
    %c2_58 = arith.constant 2 : index
    %c0_59 = arith.constant 0 : index
    %c0_60 = arith.constant 0 : index
    %87 = vector.load %arg8[%c2_58, %c0_59, %c0_60] : memref<4x8x16xf32, #tpu.memory_space<vmem>>, vector<1x8x16xf32>
    %88 = vector.shape_cast %87 : vector<1x8x16xf32> to vector<8x16xf32>
    %cst_61 = arith.constant dense<0.000000e+00> : vector<8x8xf32>
    %89 = tpu.matmul %6, %88, %cst_61 {dimension_numbers = #tpu.dot_dimension_numbers<[1], [1], [0], [0], [0, 0, 1, 0], [], []>} : vector<8x16xf32>, vector<8x16xf32>, vector<8x8xf32> -> vector<8x8xf32>
    %90 = vector.shape_cast %83 : vector<8x8xf32> to vector<1x8x8xf32>
    %91 = vector.shape_cast %86 : vector<8x8xf32> to vector<1x8x8xf32>
    %92 = vector.shape_cast %89 : vector<8x8xf32> to vector<1x8x8xf32>
    %cst_62 = arith.constant dense<0.000000e+00> : vector<1x8x8xf32>
    %93 = tpu.matmul %90, %91, %cst_62 {dimension_numbers = #tpu.dot_dimension_numbers<[2], [2], [1], [1], [0, 0, 0, 1, 1, 1], [0], [0]>} : vector<1x8x8xf32>, vector<1x8x8xf32>, vector<1x8x8xf32> -> vector<1x8x8xf32>
    %cst_63 = arith.constant 0.353553385 : f32
    %94 = vector.broadcast %cst_63 : f32 to vector<1x8x8xf32>
    %95 = arith.mulf %93, %94 : vector<1x8x8xf32>
    %cst_64 = arith.constant -1.000000e+06 : f32
    %96 = vector.broadcast %cst_64 : f32 to vector<1x8x8xf32>
    %97 = arith.select %13, %95, %96 : vector<1x8x8xi1>, vector<1x8x8xf32>
    %cst_65 = arith.constant dense<0xFF800000> : vector<1x8xf32>
    %98 = vector.multi_reduction <maximumf>, %97, %cst_65 [2] : vector<1x8x8xf32> to vector<1x8xf32>
    %99 = vector.shape_cast %98 : vector<1x8xf32> to vector<1x8x1xf32>
    %100 = vector.broadcast %99 : vector<1x8x1xf32> to vector<1x8x8xf32>
    %101 = arith.subf %97, %100 : vector<1x8x8xf32>
    %102 = math.exp %101 : vector<1x8x8xf32>
    %cst_66 = arith.constant dense<0.000000e+00> : vector<1x8xf32>
    %103 = vector.multi_reduction <add>, %102, %cst_66 [2] : vector<1x8x8xf32> to vector<1x8xf32>
    %104 = vector.shape_cast %103 : vector<1x8xf32> to vector<1x8x1xf32>
    %105 = tpu.reciprocal %104 {approx = true} : vector<1x8x1xf32> -> vector<1x8x1xf32>
    %106 = vector.broadcast %105 : vector<1x8x1xf32> to vector<1x8x8xf32>
    %107 = arith.mulf %102, %106 : vector<1x8x8xf32>
    %cst_67 = arith.constant dense<0.000000e+00> : vector<1x8x8xf32>
    %108 = tpu.matmul %107, %92, %cst_67 {dimension_numbers = #tpu.dot_dimension_numbers<[2], [1], [1], [2], [0, 0, 0, 1, 1, 2], [0], [0]>} : vector<1x8x8xf32>, vector<1x8x8xf32>, vector<1x8x8xf32> -> vector<1x8x8xf32>
    %109 = vector.shape_cast %108 : vector<1x8x8xf32> to vector<8x8xf32>
    %c2_68 = arith.constant 2 : index
    %c0_69 = arith.constant 0 : index
    %c0_70 = arith.constant 0 : index
    %110 = vector.load %arg9[%c2_68, %c0_69, %c0_70] : memref<4x32x8xf32, #tpu.memory_space<vmem>>, vector<1x32x8xf32>
    %111 = vector.shape_cast %110 : vector<1x32x8xf32> to vector<32x8xf32>
    %cst_71 = arith.constant dense<0.000000e+00> : vector<8x32xf32>
    %112 = tpu.matmul %109, %111, %cst_71 {dimension_numbers = #tpu.dot_dimension_numbers<[1], [1], [0], [0], [0, 0, 1, 0], [], []>} : vector<8x8xf32>, vector<32x8xf32>, vector<8x32xf32> -> vector<8x32xf32>
    %113 = arith.addf %80, %112 : vector<8x32xf32>
    %c3 = arith.constant 3 : index
    %c0_72 = arith.constant 0 : index
    %c0_73 = arith.constant 0 : index
    %114 = vector.load %arg6[%c3, %c0_72, %c0_73] : memref<4x8x16xf32, #tpu.memory_space<vmem>>, vector<1x8x16xf32>
    %115 = vector.shape_cast %114 : vector<1x8x16xf32> to vector<8x16xf32>
    %cst_74 = arith.constant dense<0.000000e+00> : vector<8x8xf32>
    %116 = tpu.matmul %2, %115, %cst_74 {dimension_numbers = #tpu.dot_dimension_numbers<[1], [1], [0], [0], [0, 0, 1, 0], [], []>} : vector<8x16xf32>, vector<8x16xf32>, vector<8x8xf32> -> vector<8x8xf32>
    %c3_75 = arith.constant 3 : index
    %c0_76 = arith.constant 0 : index
    %c0_77 = arith.constant 0 : index
    %117 = vector.load %arg7[%c3_75, %c0_76, %c0_77] : memref<4x8x16xf32, #tpu.memory_space<vmem>>, vector<1x8x16xf32>
    %118 = vector.shape_cast %117 : vector<1x8x16xf32> to vector<8x16xf32>
    %cst_78 = arith.constant dense<0.000000e+00> : vector<8x8xf32>
    %119 = tpu.matmul %4, %118, %cst_78 {dimension_numbers = #tpu.dot_dimension_numbers<[1], [1], [0], [0], [0, 0, 1, 0], [], []>} : vector<8x16xf32>, vector<8x16xf32>, vector<8x8xf32> -> vector<8x8xf32>
    %c3_79 = arith.constant 3 : index
    %c0_80 = arith.constant 0 : index
    %c0_81 = arith.constant 0 : index
    %120 = vector.load %arg8[%c3_79, %c0_80, %c0_81] : memref<4x8x16xf32, #tpu.memory_space<vmem>>, vector<1x8x16xf32>
    %121 = vector.shape_cast %120 : vector<1x8x16xf32> to vector<8x16xf32>
    %cst_82 = arith.constant dense<0.000000e+00> : vector<8x8xf32>
    %122 = tpu.matmul %6, %121, %cst_82 {dimension_numbers = #tpu.dot_dimension_numbers<[1], [1], [0], [0], [0, 0, 1, 0], [], []>} : vector<8x16xf32>, vector<8x16xf32>, vector<8x8xf32> -> vector<8x8xf32>
    %123 = vector.shape_cast %116 : vector<8x8xf32> to vector<1x8x8xf32>
    %124 = vector.shape_cast %119 : vector<8x8xf32> to vector<1x8x8xf32>
    %125 = vector.shape_cast %122 : vector<8x8xf32> to vector<1x8x8xf32>
    %cst_83 = arith.constant dense<0.000000e+00> : vector<1x8x8xf32>
    %126 = tpu.matmul %123, %124, %cst_83 {dimension_numbers = #tpu.dot_dimension_numbers<[2], [2], [1], [1], [0, 0, 0, 1, 1, 1], [0], [0]>} : vector<1x8x8xf32>, vector<1x8x8xf32>, vector<1x8x8xf32> -> vector<1x8x8xf32>
    %cst_84 = arith.constant 0.353553385 : f32
    %127 = vector.broadcast %cst_84 : f32 to vector<1x8x8xf32>
    %128 = arith.mulf %126, %127 : vector<1x8x8xf32>
    %cst_85 = arith.constant -1.000000e+06 : f32
    %129 = vector.broadcast %cst_85 : f32 to vector<1x8x8xf32>
    %130 = arith.select %13, %128, %129 : vector<1x8x8xi1>, vector<1x8x8xf32>
    %cst_86 = arith.constant dense<0xFF800000> : vector<1x8xf32>
    %131 = vector.multi_reduction <maximumf>, %130, %cst_86 [2] : vector<1x8x8xf32> to vector<1x8xf32>
    %132 = vector.shape_cast %131 : vector<1x8xf32> to vector<1x8x1xf32>
    %133 = vector.broadcast %132 : vector<1x8x1xf32> to vector<1x8x8xf32>
    %134 = arith.subf %130, %133 : vector<1x8x8xf32>
    %135 = math.exp %134 : vector<1x8x8xf32>
    %cst_87 = arith.constant dense<0.000000e+00> : vector<1x8xf32>
    %136 = vector.multi_reduction <add>, %135, %cst_87 [2] : vector<1x8x8xf32> to vector<1x8xf32>
    %137 = vector.shape_cast %136 : vector<1x8xf32> to vector<1x8x1xf32>
    %138 = tpu.reciprocal %137 {approx = true} : vector<1x8x1xf32> -> vector<1x8x1xf32>
    %139 = vector.broadcast %138 : vector<1x8x1xf32> to vector<1x8x8xf32>
    %140 = arith.mulf %135, %139 : vector<1x8x8xf32>
    %cst_88 = arith.constant dense<0.000000e+00> : vector<1x8x8xf32>
    %141 = tpu.matmul %140, %125, %cst_88 {dimension_numbers = #tpu.dot_dimension_numbers<[2], [1], [1], [2], [0, 0, 0, 1, 1, 2], [0], [0]>} : vector<1x8x8xf32>, vector<1x8x8xf32>, vector<1x8x8xf32> -> vector<1x8x8xf32>
    %142 = vector.shape_cast %141 : vector<1x8x8xf32> to vector<8x8xf32>
    %c3_89 = arith.constant 3 : index
    %c0_90 = arith.constant 0 : index
    %c0_91 = arith.constant 0 : index
    %143 = vector.load %arg9[%c3_89, %c0_90, %c0_91] : memref<4x32x8xf32, #tpu.memory_space<vmem>>, vector<1x32x8xf32>
    %144 = vector.shape_cast %143 : vector<1x32x8xf32> to vector<32x8xf32>
    %cst_92 = arith.constant dense<0.000000e+00> : vector<8x32xf32>
    %145 = tpu.matmul %142, %144, %cst_92 {dimension_numbers = #tpu.dot_dimension_numbers<[1], [1], [0], [0], [0, 0, 1, 0], [], []>} : vector<8x8xf32>, vector<32x8xf32>, vector<8x32xf32> -> vector<8x32xf32>
    %146 = arith.addf %113, %145 : vector<8x32xf32>
    %147 = vector.shape_cast %41 : vector<1x8x8xf32> to vector<1x1x8x8xf32>
    %148 = vector.shape_cast %74 : vector<1x8x8xf32> to vector<1x1x8x8xf32>
    %149 = vector.shape_cast %107 : vector<1x8x8xf32> to vector<1x1x8x8xf32>
    %150 = vector.shape_cast %140 : vector<1x8x8xf32> to vector<1x1x8x8xf32>
    %151 = tpu.concatenate %147, %148, %149, %150 in 1 : vector<1x1x8x8xf32>, vector<1x1x8x8xf32>, vector<1x1x8x8xf32>, vector<1x1x8x8xf32> -> vector<1x4x8x8xf32>
    %c0_93 = arith.constant 0 : index
    %c0_94 = arith.constant 0 : index
    %c0_95 = arith.constant 0 : index
    %c0_96 = arith.constant 0 : index
    %152 = vector.load %arg11[%c0_93, %c0_94, %c0_95, %c0_96] : memref<1x4x8x8xf32, #tpu.memory_space<vmem>>, vector<1x4x8x8xf32>
    tpu.vector_store %arg11[%c0_93, %c0_94, %c0_95, %c0_96], %151 {strides = array<i32>} : memref<1x4x8x8xf32, #tpu.memory_space<vmem>>, vector<1x4x8x8xf32>,
    %153 = vector.shape_cast %146 : vector<8x32xf32> to vector<1x8x32xf32>
    %c0_97 = arith.constant 0 : index
    %c0_98 = arith.constant 0 : index
    %c0_99 = arith.constant 0 : index
    %154 = vector.load %arg10[%c0_97, %c0_98, %c0_99] : memref<1x8x32xf32, #tpu.memory_space<vmem>>, vector<1x8x32xf32>
    tpu.vector_store %arg10[%c0_97, %c0_98, %c0_99], %153 {strides = array<i32>} : memref<1x8x32xf32, #tpu.memory_space<vmem>>, vector<1x8x32xf32>,
    return
  }
  func.func @transform_0(%arg0: i32, %arg1: i32, %arg2: memref<2xi32, #tpu.memory_space<smem>>) -> (i32, i32, i32) {
    %c0_i32 = arith.constant 0 : i32
    %c0_i32_0 = arith.constant 0 : i32
    return %arg0, %arg1, %c0_i32 : i32, i32, i32
  }
  func.func @transform_1(%arg0: i32, %arg1: i32, %arg2: memref<2xi32, #tpu.memory_space<smem>>) -> (i32, i32, i32) {
    %c0_i32 = arith.constant 0 : i32
    %c0_i32_0 = arith.constant 0 : i32
    %c0_i32_1 = arith.constant 0 : i32
    return %arg0, %c0_i32, %c0_i32_0 : i32, i32, i32
  }
  func.func @transform_2(%arg0: i32, %arg1: i32, %arg2: memref<2xi32, #tpu.memory_space<smem>>) -> (i32, i32, i32) {
    %c0_i32 = arith.constant 0 : i32
    %c0_i32_0 = arith.constant 0 : i32
    %c0_i32_1 = arith.constant 0 : i32
    return %arg0, %c0_i32, %c0_i32_0 : i32, i32, i32
  }
  func.func @transform_3(%arg0: i32, %arg1: i32, %arg2: memref<2xi32, #tpu.memory_space<smem>>) -> (i32, i32, i32) {
    %c0_i32 = arith.constant 0 : i32
    %c0_i32_0 = arith.constant 0 : i32
    %c0_i32_1 = arith.constant 0 : i32
    %c0_i32_2 = arith.constant 0 : i32
    return %c0_i32, %c0_i32_0, %c0_i32_1 : i32, i32, i32
  }
  func.func @transform_4(%arg0: i32, %arg1: i32, %arg2: memref<2xi32, #tpu.memory_space<smem>>) -> (i32, i32, i32) {
    %c0_i32 = arith.constant 0 : i32
    %c0_i32_0 = arith.constant 0 : i32
    %c0_i32_1 = arith.constant 0 : i32
    %c0_i32_2 = arith.constant 0 : i32
    return %c0_i32, %c0_i32_0, %c0_i32_1 : i32, i32, i32
  }
  func.func @transform_5(%arg0: i32, %arg1: i32, %arg2: memref<2xi32, #tpu.memory_space<smem>>) -> (i32, i32, i32) {
    %c0_i32 = arith.constant 0 : i32
    %c0_i32_0 = arith.constant 0 : i32
    %c0_i32_1 = arith.constant 0 : i32
    %c0_i32_2 = arith.constant 0 : i32
    return %c0_i32, %c0_i32_0, %c0_i32_1 : i32, i32, i32
  }
  func.func @transform_6(%arg0: i32, %arg1: i32, %arg2: memref<2xi32, #tpu.memory_space<smem>>) -> (i32, i32, i32) {
    %c0_i32 = arith.constant 0 : i32
    %c0_i32_0 = arith.constant 0 : i32
    %c0_i32_1 = arith.constant 0 : i32
    %c0_i32_2 = arith.constant 0 : i32
    return %c0_i32, %c0_i32_0, %c0_i32_1 : i32, i32, i32
  }
  func.func @transform_7(%arg0: i32, %arg1: i32, %arg2: memref<2xi32, #tpu.memory_space<smem>>) -> (i32, i32, i32) {
    %c0_i32 = arith.constant 0 : i32
    %c0_i32_0 = arith.constant 0 : i32
    return %arg0, %arg1, %c0_i32 : i32, i32, i32
  }
  func.func @transform_8(%arg0: i32, %arg1: i32, %arg2: memref<2xi32, #tpu.memory_space<smem>>) -> (i32, i32, i32, i32) {
    %c0_i32 = arith.constant 0 : i32
    %c0_i32_0 = arith.constant 0 : i32
    %c0_i32_1 = arith.constant 0 : i32
    return %arg0, %c0_i32, %arg1, %c0_i32_0 : i32, i32, i32, i32
  }
}

</mosaic_0001>

<bundles_post_ra>
// kernel: tpu_custom_call.1
= control target key start
LH: loop header
LB: loop body
LE: loop exit
PB: predicated region body
PF: predicated region fallthrough
CT: control target
= control target key end

     0   :  { %s3512_s0 = inlined_call_operand.vmem [shape: s32[2], index: 0, kind: input, shape index: {}]   ;;  %s3513_s1 = inlined_call_operand.vmem [shape: f32[2,8,16], index: 1, kind: input, shape index: {}]   ;;  %s3514_s2 = inlined_call_operand.vmem [shape: f32[2,8,16], index: 2, kind: input, shape index: {}]   ;;  %s3515_s3 = inlined_call_operand.vmem [shape: f32[2,8,16], index: 3, kind: input, shape index: {}]   ;;  %s3516_s4 = inlined_call_operand.vmem [shape: f32[4,8,16], index: 4, kind: input, shape index: {}]   ;;  %s3517_s5 = inlined_call_operand.vmem [shape: f32[4,8,16], index: 5, kind: input, shape index: {}]   ;;  %s3518_s6 = inlined_call_operand.vmem [shape: f32[4,8,16], index: 6, kind: input, shape index: {}]   ;;  %s3519_s7 = inlined_call_operand.vmem [shape: f32[4,32,8], index: 7, kind: input, shape index: {}]   ;;  %s3520_s8 = inlined_call_operand.hbm [shape: f32[2,8,32], index: 8, kind: output, shape index: {0}]   ;;  %s3521_s9 = inlined_call_operand.hbm [shape: f32[2,4,8,8], index: 9, kind: output, shape index: {1}]  }
   0x1   :  { %3522 = sst [smem:[#allocation11_spill]] %s3513_s1  ;;  %s15_s11 = sshll.u32 %s3512_s0, 4  ;;  %s16_s11 = int_to_ptr.vmem [resolvable:$true] %s15_s11 }
   0x2   :  { %s2895_s12 = scalar_lea.vmem %s16_s11, 16  ;;  %p2900_p1 = scmp.lt.s32.totalorder %s16_s11, %s16_s11 }
   0x3   :  { %p2896_p0 = scmp.ne.s32.totalorder %s16_s11, %s2895_s12  ;;  %p2901_p2 = scmp.lt.s32.totalorder %s2895_s12, %s2895_s12 }
   0x5   :  { %p2902_p3 = por %p2901_p2, %p2900_p1 }
   0x7   :  { %p2903_p4 = pnand %p2902_p3, %p2896_p0 }
   0x9   :  { %2906 = shalt.err (!%p2903_p4)  }
   0xa   :  { %s3021_s13 = smov [#allocation3]  }
   0xb   :  { %18 = dma.vmem_to_smem %s16_s11, 16, %s3021_s13, [#allocation2] }
   0xc   :  { %2987 = dma.done.wait [#allocation2], 16 }
   0xd   :  { %2988 = vsyncadd [#allocation2], 4294967280 }
   0xe   :  { %20 = sfence }
   0xf   :  { %21 = vsyncpa [#allocation5], 0 }
  0x10   :  { %23 = vsyncpa [#allocation5 + $0x1], 0 }
  0x11   :  { %24 = vsyncpa [#allocation7], 0 }
  0x12   :  { %26 = vsyncpa [#allocation7 + $0x1], 0  ;;  %s3082_s14 = smov 0   ;;  %s3084_s0 = smov 0  }
  0x13   :  { %s3086_s15 = smov 0   ;;  %s3088_s16 = smov 0  }
  0x14   :  { %s3090_s17 = smov 0   ;;  %s3092_s18 = smov 0  }
  0x15 LB: > { %s2477_s19 = sadd.s32 4294967295, %s3019_s18   ;;  %s2478_s20 = sadd.s32 4294967294, %s3019_s18   ;;  %s3019_s18 = sphi %s3092_s18, %s32_s18   ;;  %s3015_s17 = sphi %s3090_s17, %s3534_s17   ;;  %s3011_s16 = sphi %s3088_s16, %s3533_s16   ;;  %s3007_s15 = sphi %s3086_s15, %s3532_s15   ;;  %s3003_s0 = sphi %s3084_s0, %s3531_s0   ;;  %s2999_s14 = sphi %s3082_s14, %s3530_s14  }
  0x16   : > { %s44_s21 = sadd.s32 1, %s3015_s17  ;;  %s217_s22 = sadd.s32 1, %s3007_s15 }
  0x17   : > { %p46_p5 = scmp.ge.s32.totalorder %s44_s21, 2  ;;  %p227_p6 = scmp.ne.s32.totalorder %s3007_s15, %s3003_s0 }
  0x18   : > { %p228_p7 = scmp.eq.s32.totalorder %s2477_s19, 1  ;;  %p233_p8 = scmp.ne.s32.totalorder %s3003_s0, %s2999_s14 }
  0x19   : > { %s3536_s21 = smov (%p46_p5, %s44_s21), 0  ;;  %p234_p10 = scmp.eq.s32.totalorder %s2478_s20, 1 }
  0x1a   : > { %p3122_p9 = por %p228_p7, %p227_p6  ;;  %s212_s24 = ssub.s32 %s3015_s17, %s3536_s21 }
  0x1b   : > { %p2481_p11 = scmp.ge.s32.totalorder %s3019_s18, 1  ;;  %p215_p12 = scmp.eq.s32.totalorder %s212_s24, 0 }
  0x1c   : > { %p3129_p13 = por %p234_p10, %p233_p8  ;;  %p316_p0 = scmp.lt.s32.totalorder %s3019_s18, 3 }
  0x1d   : > { %s3135_s26 = scalar_select %p215_p12, %s3007_s15, %s217_s22  }
  0x1e   : > { %p317_p1 = pnand %p2481_p11, %p316_p0 }
  0x1f   : > { %v388_v0 = vld [vmem:[%s3516_s4] sm:$0xff] (!%p317_p1)  ;;  %vm389_vm0 = vcmask (!%p317_p1), 130048   ;;  %p365_p2 = scmp.lt.s32.totalorder (!%p317_p1), %s3011_s16, 1  ;;  %v3022_v1 = vmov (!%p317_p1), 0.0   ;;  %vm3023_vm1 = vmmov (!%p317_p1), 0   ;;  %s3525_s1 = sld [smem:[#allocation11_spill]] (!%p317_p1)  ;;  %v383_v11 = vlaneseq (!%p317_p1) }
  0x20   : > { %320 = sbr.rel (%p317_p1) target bundleno = 3696 (0xe70), region = 48  ;;  %2632 = vmatprep.subr.mxu0 (!%p317_p1), %v3022_v1  ;;  %2634 = vmatprep.mubr.msk.f32.mxu0 (!%p317_p1), %vm3023_vm1, %v3022_v1  ;;  %v466_v2 = vld [vmem:[%s3517_s5] sm:$0xff] (!%p317_p1)  ;;  %vm620_vm2 = vcmask (!%p317_p1), 64512   ;;  %v2496_v27 = vld [vmem:[%s3516_s4 + $0x8] sm:$0xff] (!%p317_p1)  ;;  %s3212_s19 = sand.u32 (!%p317_p1), 1, %s3003_s0   ;;  %v3024_v41 = vmov (!%p317_p1), 0.0|0.0  }
  0x21   : > { %2633 = vmatpush3.xpose.msk.msra.mxu0 (!%p317_p1), %vm389_vm0, %v388_v0  ;;  %2647 = vmatprep.subr.mxu1 (!%p317_p1), %v3022_v1  ;;  %v543_v9 = vld [vmem:[%s3518_s6] sm:$0xff] (!%p317_p1)  ;;  %v384_v12 = vand.u32 (!%p317_p1), 127, %v383_v11  ;;  %s2483_s20 = sshll.u32 (!%p317_p1), %s3212_s19, 5  ;;  %v2499_v31 = vld [vmem:[%s3517_s5 + $0x8] sm:$0xff] (!%p317_p1)  ;;  %vm3241_vm4 = vmpackc.low (!%p317_p1), %vm620_vm2, %vm620_vm2 }
  0x22   : > { %2637 = vmatprep.subr.mxu0 (!%p317_p1), %v3022_v1  ;;  %2649 = vmatprep.mubr.msk.f32.mxu1 (!%p317_p1), %vm3023_vm1, %v3022_v1  ;;  %s3219_s27 = scalar_lea.vmem (!%p317_p1), [#allocation6], %s2483_s20  ;;  %v783_v36 = vld [vmem:[%s3519_s7] sm:$0xff] (!%p317_p1)  ;;  %v784_v37 = vld [vmem:[%s3519_s7 + $0x8] sm:$0xff] (!%p317_p1)  ;;  %v785_v43 = vld [vmem:[%s3519_s7 + $0x10] sm:$0xff] (!%p317_p1)  ;;  %s2571_s20 = sshll.u32 (!%p317_p1), %s3011_s16, 9 }
  0x23   : > { %v2785_v40 = vpack.c.bf16 (!%p317_p1), %v784_v37, %v783_v36  ;;  %v786_v44 = vld [vmem:[%s3519_s7 + $0x18] sm:$0xff] (!%p317_p1)  ;;  %v2502_v46 = vld [vmem:[%s3518_s6 + $0x8] sm:$0xff] (!%p317_p1)  ;;  %v2508_v60 = vld [vmem:[%s3519_s7 + $0x20] sm:$0xff] (!%p317_p1)  ;;  %s2345_s13 = sshll.u32 (!%p317_p1), %s3219_s27, 4  ;;  %s3432_s28 = scalar_lea.hbm (!%p317_p1), %s3521_s9, %s2571_s20  ;;  %s3427_s13 = int_to_ptr.vmem [resolvable:$true] %s2345_s13 }
  0x24   : > { %v2789_v45 = vpack.c.bf16 (!%p317_p1), %v786_v44, %v785_v43  ;;  %v2509_v61 = vld [vmem:[%s3519_s7 + $0x28] sm:$0xff] (!%p317_p1)  ;;  %v2525_v11 = vld [vmem:[%s3517_s5 + $0x10] sm:$0xff] (!%p317_p1)  ;;  %v2537_v36 = vld [vmem:[%s3519_s7 + $0x58] sm:$0xff] (!%p317_p1)  ;;  %s2907_s10 = scalar_lea.vmem (!%p317_p1), %s3427_s13, 512 }
  0x25   : > { %v2777_v63 = vpack.c.bf16 (!%p317_p1), %v2509_v61, %v2508_v60  ;;  %v2543_v43 = vld [vmem:[%s3516_s4 + $0x18] sm:$0xff] (!%p317_p1)  ;;  %v2556_v15 = vld [vmem:[%s3519_s7 + $0x68] sm:$0xff] (!%p317_p1)  ;;  %p2908_p3 = scmp.ne.s32.totalorder (!%p317_p1), %s3427_s13, %s2907_s10 }
  0x26   : > { %v2546_v44 = vld [vmem:[%s3517_s5 + $0x18] sm:$0xff] (!%p317_p1) }
  0x27   : > { %s366_s29 = scalar_select %p365_p2, %s3011_s16, 1 }
  0x28   : > { %p2909_p4 = pnand %p2908_p3, %p3122_p9 }
  0x29   : > { %s2484_s30 = sshll.u32 %s366_s29, 3  ;;  %s2317_s29 = scalar_lea.sflag [#allocation7], %s3212_s19 }
  0x2a   : > { %s371_s12 = scalar_lea.vmem %s3525_s1, %s2484_s30  ;;  %s375_s24 = scalar_lea.vmem %s3514_s2, %s2484_s30 }
  0x2b   : > { %v3159_v3 = vld [vmem:[%s371_s12] sm:$0xff]  ;;  %s379_s11 = scalar_lea.vmem %s3515_s3, %s2484_s30  ;;  %s385_s12 = sld [smem:[#allocation3 + %s3011_s16]] }
  0x2c   : > { %2635 = vmatmul.mubr.msk.f32.vlgmr.msra.gmra.mrb[0].mxu0 %vm389_vm0, %v3159_v3  ;;  %v3166_v4 = vld [vmem:[%s375_s24] sm:$0xff]  ;;  %p2910_p5 = pneg %p2909_p4 }
  0x2d   : > { %2638 = vmatpush3.xpose.msk.msra.mxu0 %vm389_vm0, %v466_v2  ;;  %2639 = vmatprep.mubr.msk.f32.mxu0 %vm3023_vm1, %v3022_v1  ;;  %v3185_v10 = vld [vmem:[%s379_s11] sm:$0xff]  ;;  %v2510_v2 = vld [vmem:[%s3519_s7 + $0x30] sm:$0xff]  ;;  %s3025_s11 = smov [#allocation6]  }
  0x2e   : > { %2642 = vmatprep.subr.mxu0 %v3022_v1 }
  0x30   : > { %2640 = vmatmul.mubr.msk.f32.vlgmr.msra.gmra.mrb[2].mxu0 %vm389_vm0, %v3166_v4 }
  0x31   : > { %2644 = vmatprep.mubr.msk.f32.mxu0 %vm3023_vm1, %v3022_v1  ;;  %2643 = vmatpush3.xpose.msk.msra.mxu0 %vm389_vm0, %v543_v9  ;;  %v386_v13 = vstv %s385_s12  ;;  %s2911_s12 = sshll.u32 %s3025_s11, 4  ;;  %s2912_s12 = int_to_ptr.vmem [resolvable:$false] %s2911_s12 }
  0x32   : > { %2652 = vmatprep.subr.mxu0 %v3022_v1  ;;  %vm3193_vm3 = vcmp.lt.s32.totalorder %v384_v12, %v386_v13  ;;  %v2528_v12 = vld [vmem:[%s3518_s6 + $0x10] sm:$0xff]  ;;  %p2914_p6 = scmp.lt.s32.totalorder %s3427_s13, %s2912_s12 }
  0x34   : > { %2645 = vmatmul.mubr.msk.f32.vlgmr.msra.gmra.mrb[4].mxu0 %vm389_vm0, %v3185_v10 }
  0x35   : > { %2654 = vmatprep.mubr.msk.f32.mxu0 %vm3023_vm1, %v3022_v1 }
  0xff   : > { %v462_v5 = vpop.f32.mrb[0].mxu0 }
 0x100   : > { %v2636_v6 = vpop.f32.mrb[1].mxu0 }
 0x103   : > { %v539_v7 = vpop.f32.mrb[2].mxu0 }
 0x104   : > { %v2641_v8 = vpop.f32.mrb[3].mxu0  ;;  %2648 = vmatpush3.xpose.msk.msra.mxu1 %vm620_vm2, %v539_v7  ;;  %v2522_v7 = vld [vmem:[%s3516_s4 + $0x10] sm:$0xff] }
 0x105   : > { %2657 = vmatprep.subr.mxu1 %v3022_v1 }
 0x107   : > { %2650 = vmatmul.mubr.msk.f32.vlgmr.msra.gmra.mrb[0].mxu1 %vm620_vm2, %v462_v5  ;;  %v616_v25 = vpop.f32.mrb[4].mxu0  ;;  %v2511_v5 = vld [vmem:[%s3519_s7 + $0x38] sm:$0xff] }
 0x108   : > { %2659 = vmatprep.mubr.msk.f32.mxu1 %vm3023_vm1, %v3022_v1  ;;  %v2646_v26 = vpop.f32.mrb[5].mxu0  ;;  %2653 = vmatpush3.msra.mxu0 %v616_v25  ;;  %v2781_v6 = vpack.c.bf16 %v2511_v5, %v2510_v2 }
 0x109   : > { %2662 = vmatprep.subr.mxu0 %v3022_v1  ;;  %2658 = vmatpush3.xpose.msk.msra.mxu1 %vm389_vm0, %v2496_v27 }
 0x10a   : > { %2667 = vmatprep.subr.mxu1 %v3022_v1 }
 0x10c   : > { %2660 = vmatmul.mubr.msk.f32.vlgmr.msra.gmra.mrb[2].mxu1 %vm389_vm0, %v3159_v3 }
 0x10d   : > { %2669 = vmatprep.mubr.msk.f32.mxu1 %vm3023_vm1, %v3022_v1  ;;  %2668 = vmatpush3.xpose.msk.msra.mxu1 %vm389_vm0, %v2502_v46 }
 0x10e   : > { %2677 = vmatprep.subr.mxu1 %v3022_v1 }
 0x110   : > { %2670 = vmatmul.mubr.msk.f32.vlgmr.msra.gmra.mrb[4].mxu1 %vm389_vm0, %v3185_v10 }
 0x111   : > { %2679 = vmatprep.mubr.msk.f32.mxu1 %vm3023_vm1, %v3022_v1 }
 0x1da   : > { %v693_v14 = vpop.f32.mrb[0].mxu1 }
 0x1db   : > { %v697_v16 = vmul.f32 0.35355338, %v693_v14  ;;  %v2651_v17 = vpop.f32.mrb[1].mxu1 }
 0x1dd   : > { %v698_v18 = vsel %vm3193_vm3, %v697_v16, -1000000.0 }
 0x1de   : > { %v699_v19 = vsel %vm620_vm2, %v698_v18, -inf }
 0x1df   : > { %700 = vmax.xlane.f32.xlu0 %v699_v19  ;;  %v858_v32 = vpop.f32.mrb[2].mxu1 }
 0x1e0   : > { %v2661_v33 = vpop.f32.mrb[3].mxu1 }
 0x1e1   : > { %v2535_v33 = vld [vmem:[%s3519_s7 + $0x48] sm:$0xff] }
 0x1e3   : > { %v1008_v57 = vpop.f32.mrb[4].mxu1 }
 0x1e4   : > { %v2671_v58 = vpop.f32.mrb[5].mxu1  ;;  %2678 = vmatpush3.msra.mxu1 %v1008_v57 }
 0x1e5   : > { %2776 = vmatprep.subr.bf16.mxu1 %v3024_v41 }
 0x26c   : > { %v701_v20 = vpop.xlane.xlu0 %700 }
 0x26d   : > { %v702_v21 = vsub.f32 %v698_v18, %v701_v20 }
 0x26f   : > { %v703_v22 = vmul.f32 1.442695, %v702_v21 }
 0x271   : > { %2879 = vpow2.f32 %v703_v22 }
 0x27b   : > { %v2880_v23 = vpop.eup %2879 }
 0x27c   : > { %v705_v24 = vsel %vm620_vm2, %v2880_v23, 0.0 }
 0x27d   : > { %706 = vadd.xlane.f32.xlu0 %v705_v24 }
 0x30a   : > { %v707_v28 = vpop.xlane.xlu0 %706 }
 0x30b   : > { %2881 = vrcp.f32 %v707_v28 }
 0x315   : > { %v2882_v29 = vpop.eup %2881 }
 0x316   : > { %v709_v30 = vmul.f32 %v2882_v29, %v2880_v23 }
 0x318   : > { %2655 = vmatmul.mubr.msk.f32.vlgmr.msra.gmra.mrb[6].mxu0 %vm620_vm2, %v709_v30  ;;  %2305 = vst.msk [vmem:[%s3219_s27] sm:$0xff] %vm620_vm2, %v709_v30 }
 0x319   : > { %2663 = vmatpush3.xpose.msk.msra.mxu0 %vm389_vm0, %v2499_v31  ;;  %2664 = vmatprep.mubr.msk.f32.mxu0 %vm3023_vm1, %v3022_v1 }
 0x31a   : > { %2672 = vmatprep.subr.mxu0 %v3022_v1 }
 0x31c   : > { %2665 = vmatmul.mubr.msk.f32.vlgmr.msra.gmra.mrb[8].mxu0 %vm389_vm0, %v3166_v4 }
 0x31d   : > { %2674 = vmatprep.mubr.msk.f32.mxu0 %vm3023_vm1, %v3022_v1 }
 0x3eb   : > { %v779_v34 = vpop.f32.mrb[6].mxu0 }
 0x3ec   : > { %v2656_v35 = vpop.f32.mrb[7].mxu0 }
 0x3ed   : > { %v2536_v35 = vld [vmem:[%s3519_s7 + $0x50] sm:$0xff] }
 0x3ee   : > { %v2797_v37 = vpack.c.bf16 %v2537_v36, %v2536_v35 }
 0x3ef   : > { %v933_v38 = vpop.f32.mrb[8].mxu0 }
 0x3f0   : > { %v2666_v39 = vpop.f32.mrb[9].mxu0  ;;  %2673 = vmatpush3.xpose.msk.msra.mxu0 %vm620_vm2, %v933_v38 }
 0x3f1   : > { %2784 = vmatprep.subr.bf16.mxu0 %v3024_v41 }
 0x3f3   : > { %2675 = vmatmul.mubr.msk.f32.vlgmr.msra.gmra.mrb[10].mxu0 %vm620_vm2, %v858_v32  ;;  %v2534_v32 = vld [vmem:[%s3519_s7 + $0x40] sm:$0xff] }
 0x3f4   : > { %2787 = vmatpush3.bf16.xpose.msk.msra.mxu0 %vm3241_vm4, %v2785_v40  ;;  %2701 = vmatprep.mubr.msk.f32.mxu0 %vm3023_vm1, %v3022_v1 }
 0x3f5   : > { %2788 = vmatprep.subr.bf16.mxu0 %v3024_v41 }
 0x3fc   : > { %2791 = vmatpush3.bf16.xpose.msk.msra.mxu0 %vm3241_vm4, %v2789_v45  ;;  %v2549_v45 = vld [vmem:[%s3518_s6 + $0x18] sm:$0xff] }
 0x3fd   : > { %2792 = vmatprep.subr.bf16.mxu0 %v3024_v41 }
 0x403   : > { %2702 = vmatmul.mubr.msk.f32.vlgmr.msra.gmra.mrb[12].mxu0 %vm620_vm2, %v779_v34  ;;  %v2793_v34 = vpack.c.bf16 %v2535_v33, %v2534_v32 }
 0x404   : > { %2737 = vmatprep.mubr.msk.f32.mxu0 %vm3023_vm1, %v3022_v1 }
 0x405   : > { %2795 = vmatpush3.bf16.xpose.msk.msra.mxu0 %vm3241_vm4, %v2793_v34 }
 0x406   : > { %2796 = vmatprep.subr.bf16.mxu0 %v3024_v41 }
 0x40d   : > { %2799 = vmatpush3.bf16.xpose.msk.msra.mxu0 %vm3241_vm4, %v2797_v37 }
 0x40e   : > { %2800 = vmatprep.subr.bf16.mxu0 %v3024_v41 }
 0x4c6   : > { %v1084_v47 = vpop.f32.mrb[10].mxu0 }
 0x4c7   : > { %v1088_v48 = vmul.f32 0.35355338, %v1084_v47  ;;  %v2676_v49 = vpop.f32.mrb[11].mxu0 }
 0x4c9   : > { %v1089_v50 = vsel %vm3193_vm3, %v1088_v48, -1000000.0 }
 0x4ca   : > { %v1090_v51 = vsel %vm620_vm2, %v1089_v50, -inf }
 0x4cb   : > { %1091 = vmax.xlane.f32.xlu1 %v1090_v51 }
 0x558   : > { %v1092_v52 = vpop.xlane.xlu1 %1091 }
 0x559   : > { %v1093_v53 = vsub.f32 %v1089_v50, %v1092_v52 }
 0x55b   : > { %v1094_v54 = vmul.f32 1.442695, %v1093_v53 }
 0x55d   : > { %2883 = vpow2.f32 %v1094_v54 }
 0x567   : > { %v2884_v55 = vpop.eup %2883 }
 0x568   : > { %v1096_v56 = vsel %vm620_vm2, %v2884_v55, 0.0 }
 0x569   : > { %1097 = vadd.xlane.f32.xlu1 %v1096_v56 }
 0x5f6   : > { %v1098_v59 = vpop.xlane.xlu1 %1097 }
 0x5f7   : > { %2885 = vrcp.f32 %v1098_v59 }
 0x601   : > { %v2886_v62 = vpop.eup %2885 }
 0x602   : > { %v1100_v0 = vmul.f32 %v2886_v62, %v2884_v55  ;;  %v2557_v62 = vld [vmem:[%s3519_s7 + $0x70] sm:$0xff] }
 0x604   : > { %2680 = vmatmul.mubr.msk.f32.vlgmr.msra.gmra.mrb[6].mxu1 %vm620_vm2, %v1100_v0  ;;  %2306 = vst.msk [vmem:[%s3219_s27 + $0x8] sm:$0xff] %vm620_vm2, %v1100_v0 }
 0x605   : > { %2779 = vmatpush3.bf16.xpose.msk.msra.mxu1 %vm3241_vm4, %v2777_v63  ;;  %2690 = vmatprep.mubr.msk.f32.mxu1 %vm3023_vm1, %v3022_v1  ;;  %v2558_v63 = vld [vmem:[%s3519_s7 + $0x78] sm:$0xff] }
 0x606   : > { %2780 = vmatprep.subr.bf16.mxu1 %v3024_v41  ;;  %v2805_v0 = vpack.c.bf16 %v2558_v63, %v2557_v62 }
 0x60d   : > { %2783 = vmatpush3.bf16.xpose.msk.msra.mxu1 %vm3241_vm4, %v2781_v6 }
 0x60e   : > { %2704 = vmatprep.subr.mxu1 %v3022_v1 }
 0x6d7   : > { %v1170_v8 = vpop.f32.mrb[6].mxu1 }
 0x6d8   : > { %v2681_v9 = vpop.f32.mrb[7].mxu1  ;;  %2691 = vmatmul.mubr.msk.f32.vlgmr.msra.gmra.mrb[8].mxu1 %vm620_vm2, %v1170_v8 }
 0x6d9   : > { %2705 = vmatpush3.xpose.msk.msra.mxu1 %vm389_vm0, %v2522_v7  ;;  %2706 = vmatprep.mubr.msk.f32.mxu1 %vm3023_vm1, %v3022_v1 }
 0x6da   : > { %2709 = vmatprep.subr.mxu1 %v3022_v1 }
 0x6dc   : > { %2707 = vmatmul.mubr.msk.f32.vlgmr.msra.gmra.mrb[10].mxu1 %vm389_vm0, %v3159_v3 }
 0x6dd   : > { %2710 = vmatpush3.xpose.msk.msra.mxu1 %vm389_vm0, %v2525_v11  ;;  %2711 = vmatprep.mubr.msk.f32.mxu1 %vm3023_vm1, %v3022_v1 }
 0x6de   : > { %2714 = vmatprep.subr.mxu1 %v3022_v1 }
 0x6e0   : > { %2712 = vmatmul.mubr.msk.f32.vlgmr.msra.gmra.mrb[12].mxu1 %vm389_vm0, %v3166_v4 }
 0x6e1   : > { %2716 = vmatprep.mubr.msk.f32.mxu1 %vm3023_vm1, %v3022_v1  ;;  %2715 = vmatpush3.xpose.msk.msra.mxu1 %vm389_vm0, %v2528_v12 }
 0x6e2   : > { %2719 = vmatprep.subr.mxu1 %v3022_v1 }
 0x6e4   : > { %2717 = vmatmul.mubr.msk.f32.vlgmr.msra.gmra.mrb[14].mxu1 %vm389_vm0, %v3185_v10 }
 0x6e5   : > { %2721 = vmatprep.mubr.msk.f32.mxu1 %vm3023_vm1, %v3022_v1 }
 0x7ab   : > { %v3330_v13 = vpop.f32.mrb[8].mxu1 }
 0x7ac   : > { %v2692_v14 = vpop.f32.mrb[9].mxu1 }
 0x7af   : > { %v1420_v16 = vpop.f32.mrb[10].mxu1 }
 0x7b0   : > { %v2708_v17 = vpop.f32.mrb[11].mxu1 }
 0x7b3   : > { %v1495_v18 = vpop.f32.mrb[12].mxu1 }
 0x7b4   : > { %v2713_v19 = vpop.f32.mrb[13].mxu1  ;;  %2720 = vmatpush3.xpose.msk.msra.mxu1 %vm620_vm2, %v1495_v18 }
 0x7b5   : > { %2724 = vmatprep.subr.mxu1 %v3022_v1 }
 0x7b7   : > { %2722 = vmatmul.mubr.msk.f32.vlgmr.msra.gmra.mrb[16].mxu1 %vm620_vm2, %v1420_v16  ;;  %v1570_v20 = vpop.f32.mrb[14].mxu1 }
 0x7b8   : > { %2726 = vmatprep.mubr.msk.f32.mxu1 %vm3023_vm1, %v3022_v1  ;;  %v2718_v21 = vpop.f32.mrb[15].mxu1  ;;  %2725 = vmatpush3.msra.mxu1 %v1570_v20 }
 0x7b9   : > { %2740 = vmatprep.subr.mxu1 %v3022_v1 }
 0x88a   : > { %v1646_v22 = vpop.f32.mrb[16].mxu1 }
 0x88b   : > { %v1650_v23 = vmul.f32 0.35355338, %v1646_v22  ;;  %v2723_v24 = vpop.f32.mrb[17].mxu1 }
 0x88d   : > { %v1651_v25 = vsel %vm3193_vm3, %v1650_v23, -1000000.0 }
 0x88e   : > { %v1652_v26 = vsel %vm620_vm2, %v1651_v25, -inf }
 0x88f   : > { %1653 = vmax.xlane.f32.xlu0 %v1652_v26 }
 0x91c   : > { %v1654_v27 = vpop.xlane.xlu0 %1653 }
 0x91d   : > { %v1655_v28 = vsub.f32 %v1651_v25, %v1654_v27 }
 0x91f   : > { %v1656_v29 = vmul.f32 1.442695, %v1655_v28 }
 0x921   : > { %2887 = vpow2.f32 %v1656_v29 }
 0x92b   : > { %v2888_v30 = vpop.eup %2887 }
 0x92c   : > { %v1658_v31 = vsel %vm620_vm2, %v2888_v30, 0.0 }
 0x92d   : > { %1659 = vadd.xlane.f32.xlu1 %v1658_v31 }
 0x9ba   : > { %v1660_v38 = vpop.xlane.xlu1 %1659 }
 0x9bb   : > { %2889 = vrcp.f32 %v1660_v38 }
 0x9c5   : > { %v2890_v39 = vpop.eup %2889 }
 0x9c6   : > { %v1662_v40 = vmul.f32 %v2890_v39, %v2888_v30 }
 0x9c8   : > { %2727 = vmatmul.mubr.msk.f32.vlgmr.msra.gmra.mrb[18].mxu1 %vm620_vm2, %v1662_v40  ;;  %2307 = vst.msk [vmem:[%s3219_s27 + $0x10] sm:$0xff] %vm620_vm2, %v1662_v40 }
 0x9c9   : > { %2741 = vmatpush3.xpose.msk.msra.mxu1 %vm389_vm0, %v2543_v43  ;;  %2742 = vmatprep.mubr.msk.f32.mxu1 %vm3023_vm1, %v3022_v1 }
 0x9ca   : > { %2745 = vmatprep.subr.mxu1 %v3022_v1 }
 0x9cc   : > { %2743 = vmatmul.mubr.msk.f32.vlgmr.msra.gmra.mrb[20].mxu1 %vm389_vm0, %v3159_v3 }
 0x9cd   : > { %2746 = vmatpush3.xpose.msk.msra.mxu1 %vm389_vm0, %v2546_v44  ;;  %2747 = vmatprep.mubr.msk.f32.mxu1 %vm3023_vm1, %v3022_v1 }
 0x9ce   : > { %2750 = vmatprep.subr.mxu1 %v3022_v1 }
 0x9d0   : > { %2748 = vmatmul.mubr.msk.f32.vlgmr.msra.gmra.mrb[22].mxu1 %vm389_vm0, %v3166_v4 }
 0x9d1   : > { %2752 = vmatprep.mubr.msk.f32.mxu1 %vm3023_vm1, %v3022_v1  ;;  %2751 = vmatpush3.xpose.msk.msra.mxu1 %vm389_vm0, %v2549_v45 }
 0x9d2   : > { %2755 = vmatprep.subr.mxu1 %v3022_v1 }
 0x9d4   : > { %2753 = vmatmul.mubr.msk.f32.vlgmr.msra.gmra.mrb[24].mxu1 %vm389_vm0, %v3185_v10 }
 0x9d5   : > { %2757 = vmatprep.mubr.msk.f32.mxu1 %vm3023_vm1, %v3022_v1 }
 0xa9b   : > { %v1732_v3 = vpop.f32.mrb[18].mxu1 }
 0xa9c   : > { %v2728_v46 = vpop.f32.mrb[19].mxu1  ;;  %2738 = vmatmul.mubr.msk.f32.vlgmr.msra.gmra.mrb[12].mxu0 %vm620_vm2, %v1732_v3 }
 0xa9d   : > { %2773 = vmatprep.mubr.msk.f32.mxu0 %vm3023_vm1, %v3022_v1 }
 0xa9f   : > { %v1898_v4 = vpop.f32.mrb[20].mxu1 }
 0xaa0   : > { %v2744_v47 = vpop.f32.mrb[21].mxu1 }
 0xaa3   : > { %v1973_v48 = vpop.f32.mrb[22].mxu1 }
 0xaa4   : > { %v2749_v49 = vpop.f32.mrb[23].mxu1  ;;  %2756 = vmatpush3.xpose.msk.msra.mxu1 %vm620_vm2, %v1973_v48 }
 0xaa5   : > { %2760 = vmatprep.subr.mxu1 %v3022_v1 }
 0xaa7   : > { %2758 = vmatmul.mubr.msk.f32.vlgmr.msra.gmra.mrb[26].mxu1 %vm620_vm2, %v1898_v4  ;;  %v2048_v10 = vpop.f32.mrb[24].mxu1 }
 0xaa8   : > { %2762 = vmatprep.mubr.msk.f32.mxu1 %vm3023_vm1, %v3022_v1  ;;  %v2754_v50 = vpop.f32.mrb[25].mxu1  ;;  %2761 = vmatpush3.msra.mxu1 %v2048_v10  ;;  %v2555_v1 = vld [vmem:[%s3519_s7 + $0x60] sm:$0xff] }
 0xaa9   : > { %v2801_v61 = vpack.c.bf16 %v2556_v15, %v2555_v1 }
 0xaab   : > { %2803 = vmatpush3.bf16.xpose.msk.msra.mxu0 %vm3241_vm4, %v2801_v61 }
 0xaac   : > { %2804 = vmatprep.subr.bf16.mxu0 %v3024_v41 }
 0xab3   : > { %2807 = vmatpush3.bf16.xpose.msk.msra.mxu0 %vm3241_vm4, %v2805_v0 }
 0xb7a   : > { %v2124_v51 = vpop.f32.mrb[26].mxu1 }
 0xb7b   : > { %v2128_v52 = vmul.f32 0.35355338, %v2124_v51  ;;  %v2759_v53 = vpop.f32.mrb[27].mxu1 }
 0xb7d   : > { %v2129_v54 = vsel %vm3193_vm3, %v2128_v52, -1000000.0 }
 0xb7e   : > { %v2130_v55 = vsel %vm620_vm2, %v2129_v54, -inf }
 0xb7f   : > { %2131 = vmax.xlane.f32.xlu0 %v2130_v55 }
 0xc0c   : > { %v2132_v56 = vpop.xlane.xlu0 %2131 }
 0xc0d   : > { %v2133_v57 = vsub.f32 %v2129_v54, %v2132_v56 }
 0xc0f   : > { %v2134_v58 = vmul.f32 1.442695, %v2133_v57 }
 0xc11   : > { %2891 = vpow2.f32 %v2134_v58 }
 0xc1b   : > { %v2892_v59 = vpop.eup %2891 }
 0xc1c   : > { %v2136_v60 = vsel %vm620_vm2, %v2892_v59, 0.0 }
 0xc1d   : > { %2137 = vadd.xlane.f32.xlu1 %v2136_v60 }
 0xcaa   : > { %v2138_v2 = vpop.xlane.xlu1 %2137 }
 0xcab   : > { %2893 = vrcp.f32 %v2138_v2 }
 0xcb5   : > { %v2894_v5 = vpop.eup %2893 }
 0xcb6   : > { %v2140_v6 = vmul.f32 %v2894_v5, %v2892_v59 }
 0xcb8   : > { %2763 = vmatmul.mubr.msk.f32.vlgmr.msra.gmra.mrb[28].mxu1 %vm620_vm2, %v2140_v6  ;;  %2308 = vst.msk [vmem:[%s3219_s27 + $0x18] sm:$0xff] %vm620_vm2, %v2140_v6  ;;  %s2913_s27 = scalar_lea.vmem %s2912_s12, 1024 }
 0xcb9   : > { %p2915_p7 = scmp.lt.s32.totalorder %s2913_s27, %s2907_s10 }
 0xcbb   : > { %p2916_p8 = por %p2915_p7, %p2914_p6 }
 0xcbd   : > { %p2917_p10 = pnand %p2916_p8, %p2910_p5 }
 0xd8b   : > { %v2210_v41 = vpop.f32.mrb[28].mxu1 }
 0xd8c   : > { %v2764_v7 = vpop.f32.mrb[29].mxu1  ;;  %2774 = vmatmul.mubr.msk.f32.vlgmr.msra.gmra.mrb[12].mxu0 %vm620_vm2, %v2210_v41 }
 0xd8d   : > { %2920 = shalt.err (!%p2917_p10)
}
 0xd8e   : > { %s2921_s30 = scalar_lea.hbm %s3432_s28, 512  ;;  %s2925_s24 = scalar_lea.hbm %s3521_s9, 1024 }
 0xd8f   : > { %p2922_p11 = scmp.ne.s32.totalorder %s3432_s28, %s2921_s30  ;;  %p2926_p1 = scmp.lt.u32.totalorder %s3432_s28, %s3521_s9 }
 0xd90   : > { %p2927_p2 = scmp.lt.u32.totalorder %s2925_s24, %s2921_s30  ;;  %p2929_p4 = scmp.lt.u32.totalorder %s2921_s30, %s3432_s28 }
 0xd91   : > { %p2923_p12 = pnand %p2922_p11, %p3122_p9 }
 0xd92   : > { %p2928_p3 = por %p2927_p2, %p2926_p1 }
 0xd93   : > { %p2924_p0 = pneg %p2923_p12 }
 0xd94   : > { %p2930_p5 = por %p2929_p4, %p2928_p3 }
 0xd96   : > { %p2931_p6 = pnand %p2930_p5, %p2924_p0 }
 0xd98   : > { %2934 = shalt.err (!%p2931_p6)
}
 0xd99   : > { %s3026_s10 = smov 128   ;;  %s3027_s27 = smov 8   ;;  %vm2309_vm5 = vcmask 261120  }
 0xd9a   : > { %2814 = dma.vmem_to_hbm [thread:$0]  (%p3122_p9), %s3427_s13, 512, %s3432_s28, %s2317_s29, %s3026_s10, %s3026_s10, %s3027_s27  }
 0xd9b   : > { %s2482_s20 = sshll.u32 %s3212_s19, 3  ;;  %s2566_s22 = sshll.u32 %s3011_s16, 7 }
 0xd9c   : > { %s357_s24 = scalar_lea.vmem [#allocation4], %s2482_s20  ;;  %s3464_s1 = scalar_lea.hbm %s3520_s8, %s2566_s22 }
 0xd9d   : > { %s2331_s30 = sshll.u32 %s357_s24, 4  ;;  %s2312_s13 = scalar_lea.sflag [#allocation5], %s3212_s19  ;;  %s3466_s30 = int_to_ptr.vmem [resolvable:$true] %s2331_s30 }
 0xd9e   : > { %s2935_s16 = scalar_lea.vmem %s3466_s30, 128  ;;  %s3028_s28 = smov [#allocation4]  }
 0xd9f   : > { %p2936_p7 = scmp.ne.s32.totalorder %s3466_s30, %s2935_s16  ;;  %s2939_s29 = sshll.u32 %s3028_s28, 4  ;;  %s2940_s29 = int_to_ptr.vmem [resolvable:$false] %s2939_s29 }
 0xda0   : > { %s2941_s10 = scalar_lea.vmem %s2940_s29, 256  ;;  %p2942_p11 = scmp.lt.s32.totalorder %s3466_s30, %s2940_s29 }
 0xda1   : > { %p2937_p8 = pnand %p2936_p7, %p3122_p9  ;;  %p2943_p12 = scmp.lt.s32.totalorder %s2941_s10, %s2935_s16 }
 0xda3   : > { %p2938_p10 = pneg %p2937_p8  ;;  %p2944_p0 = por %p2943_p12, %p2942_p11 }
 0xda5   : > { %p2945_p1 = pnand %p2944_p0, %p2938_p10 }
 0xe5f   : > { %v2300_v42 = vpop.f32.mrb[12].mxu0 }
 0xe60   : > { %v2808_v8 = vadd.f32 %v2300_v42, %v3330_v13  ;;  %v2775_v9 = vpop.f32.mrb[13].mxu0 }
 0xe62   : > { %2310 = vst.msk [vmem:[%s357_s24] sm:$0xff] %vm2309_vm5, %v2808_v8 }
 0xe63   : > { %2948 = shalt.err (!%p2945_p1)
}
 0xe64   : > { %s2949_s19 = scalar_lea.hbm %s3464_s1, 128  ;;  %s2953_s22 = scalar_lea.hbm %s3520_s8, 256 }
 0xe65   : > { %p2950_p2 = scmp.ne.s32.totalorder %s3464_s1, %s2949_s19  ;;  %p2954_p5 = scmp.lt.u32.totalorder %s3464_s1, %s3520_s8 }
 0xe66   : > { %p2955_p6 = scmp.lt.u32.totalorder %s2953_s22, %s2949_s19  ;;  %p2957_p8 = scmp.lt.u32.totalorder %s2949_s19, %s3464_s1 }
 0xe67   : > { %p2951_p3 = pnand %p2950_p2, %p3122_p9 }
 0xe68   : > { %p2956_p7 = por %p2955_p6, %p2954_p5 }
 0xe69   : > { %p2952_p4 = pneg %p2951_p3 }
 0xe6a   : > { %p2958_p10 = por %p2957_p8, %p2956_p7 }
 0xe6c   : > { %p2959_p11 = pnand %p2958_p10, %p2952_p4 }
 0xe6e   : > { %2962 = shalt.err (!%p2959_p11)
}
 0xe6f   : > { %2813 = dma.vmem_to_hbm [thread:$0]  (%p3122_p9), %s3466_s30, 128, %s3464_s1, %s2312_s13  }
 0xe70 PF: > { %p2824_p12 = scmp.ge.s32.totalorder %s3019_s18, 2  ;;  %s2360_s12 = sand.u32 1, %s2999_s14  }
 0xe71   : > { %s2361_s16 = scalar_lea.sflag [#allocation5], %s2360_s12 }
 0xe72   : > { %p2818_p0 = pnand %p2824_p12, %p3129_p13 }
 0xe74   : > { %2990 = dma.done.wait (!%p2818_p0), %s2361_s16, 128  }
 0xe75   : > { %2992 = vsyncadd (!%p2818_p0), %s2361_s16, 4294967168  ;;  %s2370_s28 = scalar_lea.sflag [#allocation7], %s2360_s12 }
 0xe76   : > { %2994 = dma.done.wait (!%p2818_p0), %s2370_s28, 512  }
 0xe77   : > { %2996 = vsyncadd (!%p2818_p0), %s2370_s28, 4294966784  ;;  %s32_s18 = sadd.s32 1, %s3019_s18   ;;  %s3530_s14 = smov %s3003_s0 }
 0xe78   : > { %p29_p1 = scmp.ge.s32.totalorder %s32_s18, 4   ;;  %s3531_s0 = smov %s3007_s15 }
 0xe79   : > { %s3532_s15 = smov %s3135_s26  ;;  %s3533_s16 = smov %s3015_s17 }
 0xe7a   : > { %s3534_s17 = smov %s3536_s21  ;;  %31 = sbr.rel (!%p29_p1) target bundleno = 21 (0x15), region = 118 }
 0xe81   :  { %2375 = vsyncpa [#allocation5], 1 }
 0xe82   :  { %2377 = vsyncpa [#allocation5 + $0x1], 1 }
 0xe83   :  { %2378 = vsyncpa [#allocation7], 1 }
 0xe84   :  { %2380 = vsyncpa [#allocation7 + $0x1], 1 }

</bundles_post_ra>
